<compile_context>
chip_gen: v6e
topology: v6e:2x2x1
jax: 0.10.0
libtpu: 0.0.40
codegen_flags: <defaults>
</compile_context>

<pallas_src>
import functools

import jax
import jax.numpy as jnp
from jax.experimental import pallas as pl
from jax.experimental.pallas import tpu as pltpu

GAMMA = 1.5
ALPHA = 0.25

LANE = 128                   # lane (minor) dimension of the flattened slab
SUBLANE = 8                  # native f32 sublane tile
TARGET_ROWS_PER_STEP = 1024  # 1024x128 f32 = 512 KiB / input / pipeline buffer (~2 MiB total)
NUM_PARTS_LARGE = 2          # leading "parallel" grid axis -> both TCs on v7x


def _qfocal_kernel(pred_ref, true_ref, out_ref, *, gamma, alpha,
                   row_tile, steps_per_part, total, needs_mask):
    part = pl.program_id(0)
    step = pl.program_id(1)

    # out_ref is this part's (8, 128) vreg-shaped partial-sum accumulator.  Its
    # block index depends only on `part`, so it stays resident in VMEM across
    # the whole "arbitrary" step axis and is written back to HBM once per part.
    @pl.when(step == 0)
    def _():
        out_ref[...] = jnp.zeros_like(out_ref)

    x = pred_ref[...].astype(jnp.float32)
    t = true_ref[...].astype(jnp.float32)

    # One shared transcendental e = exp(-|x|) feeds both the stable BCE term
    # and the sigmoid (no separate jax.nn.sigmoid exp).
    e = jnp.exp(-jnp.abs(x))

    # BCEWithLogitsLoss(reduction='none'): max(x,0) - x*t + log1p(exp(-|x|))
    bce = jnp.maximum(x, 0.0) - x * t + jnp.log1p(e)

    # sigmoid(x) = 1/(1+e) for x >= 0,   e/(1+e) for x < 0   (e = exp(-|x|)).
    # NOTE: pl.reciprocal(1.0 + e, approx=True) is a drop-in replacement (same
    # single EUP rcp, fewer VPU Newton steps) at the cost of ~1e-4-level sigmoid
    # error; exact division is kept so results match the f32 reference tightly.
    inv = 1.0 / (1.0 + e)
    pred_prob = jnp.where(x >= 0.0, inv, e * inv)

    alpha_factor = t * alpha + (1.0 - t) * (1.0 - alpha)
    d = jnp.abs(t - pred_prob)
    if gamma == 1.5:
        modulating_factor = d * jnp.sqrt(d)      # one EUP sqrt, not exp(g*log(d)); safe at d=0
    elif gamma == 2.0:
        modulating_factor = d * d
    elif gamma == 1.0:
        modulating_factor = d
    else:
        modulating_factor = d ** gamma

    loss = bce * alpha_factor * modulating_factor

    if needs_mask:
        # Zero the padded tail so it contributes nothing to the sum.
        base_row = (part * steps_per_part + step) * row_tile
        row_ids = jax.lax.broadcasted_iota(jnp.int32, (row_tile, LANE), 0)
        lane_ids = jax.lax.broadcasted_iota(jnp.int32, (row_tile, LANE), 1)
        flat_idx = (base_row + row_ids) * LANE + lane_ids
        loss = jnp.where(flat_idx < total, loss, 0.0)

    # Pure-VPU accumulation into the (8, 128) accumulator; the single
    # cross-lane/sublane reduction happens once, in the wrapper.
    out_ref[...] += jnp.sum(loss.reshape(row_tile // SUBLANE, SUBLANE, LANE), axis=0)


def qfocal_loss(pred, true, gamma=GAMMA, alpha=ALPHA, reduction="mean"):
    """Quality focal loss. pred/true: logits / soft targets of identical shape (e.g. NCHW)."""
    assert pred.shape == true.shape
    total = int(pred.size)
    assert total > 0

    rows_needed = -(-total // LANE)

    if rows_needed <= TARGET_ROWS_PER_STEP:
        # Small input: a single grid step covering everything (rows rounded up to a
        # sublane multiple).
        row_tile = -(-rows_needed // SUBLANE) * SUBLANE
        num_parts, steps_per_part = 1, 1
    else:
        row_tile = TARGET_ROWS_PER_STEP
        total_steps = -(-rows_needed // row_tile)
        num_parts = NUM_PARTS_LARGE if total_steps >= NUM_PARTS_LARGE else 1
        steps_per_part = -(-total_steps // num_parts)

    padded_rows = num_parts * steps_per_part * row_tile
    padded_total = padded_rows * LANE
    needs_mask = padded_total != total

    pred_flat = jnp.ravel(pred)
    true_flat = jnp.ravel(true)
    if needs_mask:
        pad = padded_total - total
        pred_flat = jnp.pad(pred_flat, (0, pad))
        true_flat = jnp.pad(true_flat, (0, pad))
    pred2d = pred_flat.reshape(padded_rows, LANE)
    true2d = true_flat.reshape(padded_rows, LANE)

    kernel = functools.partial(
        _qfocal_kernel, gamma=gamma, alpha=alpha, row_tile=row_tile,
        steps_per_part=steps_per_part, total=total, needs_mask=needs_mask)

    in_map = lambda p, s: (p * steps_per_part + s, 0)

    partials = pl.pallas_call(
        kernel,
        out_shape=jax.ShapeDtypeStruct((num_parts * SUBLANE, LANE), jnp.float32),
        grid_spec=pltpu.PrefetchScalarGridSpec(
            num_scalar_prefetch=0,
            grid=(num_parts, steps_per_part),
            in_specs=[
                pl.BlockSpec((row_tile, LANE), in_map),
                pl.BlockSpec((row_tile, LANE), in_map),
            ],
            # One lane-dense (8,128) partial-sum block per part (per TensorCore on v7x).
            out_specs=pl.BlockSpec((SUBLANE, LANE), lambda p, s: (p, 0)),
        ),
        compiler_params=pltpu.CompilerParams(
            dimension_semantics=("parallel", "arbitrary"),
        ),
        cost_estimate=pl.CostEstimate(
            flops=16 * padded_total,
            transcendentals=4 * padded_total,
            bytes_accessed=8 * padded_total + 4 * num_parts * SUBLANE * LANE,
        ),
    )(pred2d, true2d)

    total_sum = jnp.sum(partials)
    if reduction == "mean":
        return total_sum / total
    elif reduction == "sum":
        return total_sum
    else:
        # TODO(synk): reduction='none' would need an elementwise-output kernel variant.
        raise NotImplementedError("reduction='none' not implemented in this Pallas port")


def _qfocal_ref(pred, true, gamma=GAMMA, alpha=ALPHA):
    x = pred.astype(jnp.float32)
    t = true.astype(jnp.float32)
    bce = jnp.maximum(x, 0.0) - x * t + jnp.log1p(jnp.exp(-jnp.abs(x)))
    p = jax.nn.sigmoid(x)
    loss = bce * (t * alpha + (1 - t) * (1 - alpha)) * jnp.abs(t - p) ** gamma
    return jnp.mean(loss)


def _check(shape, k1, k2):
    pred = jax.random.normal(k1, shape, dtype=jnp.float32)
    true = jax.random.uniform(k2, shape, dtype=jnp.float32)  # quality targets in [0, 1]
    out = jax.block_until_ready(qfocal_loss(pred, true))
    ref = _qfocal_ref(pred, true)
    assert jnp.allclose(out, ref, rtol=1e-4, atol=1e-6), (shape, out, ref)


if __name__ == "__main__":
    key = jax.random.PRNGKey(0)
    keys = jax.random.split(key, 6)

    # Primary small NCHW case (what the PyTorch module would receive).
    _check((2, 4, 16, 16), keys[0], keys[1])
    # Non-multiple-of-1024 size -> exercises the padded/masked single-part path.
    _check((3, 5, 17, 29), keys[2], keys[3])
    # Larger detector-head-like tensor -> exercises multi-step + 2-part parallel path.
    _check((8, 64, 76, 76), keys[4], keys[5])

    print("KERNEL_OK")
</pallas_src>

<mosaic_0001>
module attributes {stable_mosaic.version = 11 : i64} {
  func.func @_qfocal_kernel(%arg0: i32, %arg1: i32, %arg2: memref<16x128xf32, #tpu.memory_space<vmem>>, %arg3: memref<16x128xf32, #tpu.memory_space<vmem>>, %arg4: memref<8x128xf32, #tpu.memory_space<vmem>>) attributes {dimension_semantics = [#tpu.dimension_semantics<parallel>, #tpu.dimension_semantics<arbitrary>], iteration_bounds = array<i64: 1, 1>, scalar_prefetch = 0 : i64, scratch_operands = 0 : i64, tpu.core_type = #tpu.core_type<tc>, window_params = [{transform_indices = @transform_0, window_bounds = array<i64: 16, 128>}, {transform_indices = @transform_1, window_bounds = array<i64: 16, 128>}, {transform_indices = @transform_2, window_bounds = array<i64: 8, 128>}]} {
    %c0_i32 = arith.constant 0 : i32
    %0 = arith.cmpi eq, %arg1, %c0_i32 : i32
    %1 = arith.extui %0 : i1 to i32
    %c0_i32_0 = arith.constant 0 : i32
    %2 = arith.cmpi ne, %1, %c0_i32_0 : i32
    scf.if %2 {
      %cst_16 = arith.constant 0.000000e+00 : f32
      %41 = vector.broadcast %cst_16 : f32 to vector<8x128xf32>
      %c0_17 = arith.constant 0 : index
      %c0_18 = arith.constant 0 : index
      %42 = vector.load %arg4[%c0_17, %c0_18] : memref<8x128xf32, #tpu.memory_space<vmem>>, vector<8x128xf32>
      tpu.vector_store %arg4[%c0_17, %c0_18], %41 {strides = array<i32>} : memref<8x128xf32, #tpu.memory_space<vmem>>, vector<8x128xf32>,
    } else {
    }
    %c0 = arith.constant 0 : index
    %c0_1 = arith.constant 0 : index
    %3 = vector.load %arg2[%c0, %c0_1] : memref<16x128xf32, #tpu.memory_space<vmem>>, vector<16x128xf32>
    %c0_2 = arith.constant 0 : index
    %c0_3 = arith.constant 0 : index
    %4 = vector.load %arg3[%c0_2, %c0_3] : memref<16x128xf32, #tpu.memory_space<vmem>>, vector<16x128xf32>
    %5 = math.absf %3 : vector<16x128xf32>
    %cst = arith.constant 0.000000e+00 : f32
    %6 = vector.broadcast %cst : f32 to vector<16x128xf32>
    %7 = arith.subf %6, %5 : vector<16x128xf32>
    %8 = math.exp %7 : vector<16x128xf32>
    %cst_4 = arith.constant 0.000000e+00 : f32
    %9 = vector.broadcast %cst_4 : f32 to vector<16x128xf32>
    %10 = arith.maximumf %3, %9 : vector<16x128xf32>
    %11 = arith.mulf %3, %4 : vector<16x128xf32>
    %12 = arith.subf %10, %11 : vector<16x128xf32>
    %13 = math.log1p %8 : vector<16x128xf32>
    %14 = arith.addf %12, %13 : vector<16x128xf32>
    %cst_5 = arith.constant 1.000000e+00 : f32
    %15 = vector.broadcast %cst_5 : f32 to vector<16x128xf32>
    %16 = arith.addf %15, %8 : vector<16x128xf32>
    %cst_6 = arith.constant 1.000000e+00 : f32
    %17 = vector.broadcast %cst_6 : f32 to vector<16x128xf32>
    %18 = arith.divf %17, %16 : vector<16x128xf32>
    %cst_7 = arith.constant 0.000000e+00 : f32
    %19 = vector.broadcast %cst_7 : f32 to vector<16x128xf32>
    %20 = arith.cmpf oge, %3, %19 : vector<16x128xf32>
    %21 = arith.mulf %8, %18 : vector<16x128xf32>
    %22 = arith.select %20, %18, %21 : vector<16x128xi1>, vector<16x128xf32>
    %cst_8 = arith.constant 2.500000e-01 : f32
    %23 = vector.broadcast %cst_8 : f32 to vector<16x128xf32>
    %24 = arith.mulf %4, %23 : vector<16x128xf32>
    %cst_9 = arith.constant 1.000000e+00 : f32
    %25 = vector.broadcast %cst_9 : f32 to vector<16x128xf32>
    %26 = arith.subf %25, %4 : vector<16x128xf32>
    %cst_10 = arith.constant 7.500000e-01 : f32
    %27 = vector.broadcast %cst_10 : f32 to vector<16x128xf32>
    %28 = arith.mulf %26, %27 : vector<16x128xf32>
    %29 = arith.addf %24, %28 : vector<16x128xf32>
    %30 = arith.subf %4, %22 : vector<16x128xf32>
    %31 = math.absf %30 : vector<16x128xf32>
    %32 = math.sqrt %31 : vector<16x128xf32>
    %33 = arith.mulf %31, %32 : vector<16x128xf32>
    %34 = arith.mulf %14, %29 : vector<16x128xf32>
    %35 = arith.mulf %34, %33 : vector<16x128xf32>
    %c0_11 = arith.constant 0 : index
    %c0_12 = arith.constant 0 : index
    %36 = vector.load %arg4[%c0_11, %c0_12] : memref<8x128xf32, #tpu.memory_space<vmem>>, vector<8x128xf32>
    %37 = vector.shape_cast %35 : vector<16x128xf32> to vector<2x8x128xf32>
    %cst_13 = arith.constant dense<0.000000e+00> : vector<8x128xf32>
    %38 = vector.multi_reduction <add>, %37, %cst_13 [0] : vector<2x8x128xf32> to vector<8x128xf32>
    %39 = arith.addf %36, %38 : vector<8x128xf32>
    %c0_14 = arith.constant 0 : index
    %c0_15 = arith.constant 0 : index
    %40 = vector.load %arg4[%c0_14, %c0_15] : memref<8x128xf32, #tpu.memory_space<vmem>>, vector<8x128xf32>
    tpu.vector_store %arg4[%c0_14, %c0_15], %39 {strides = array<i32>} : memref<8x128xf32, #tpu.memory_space<vmem>>, vector<8x128xf32>,
    return
  }
  func.func @transform_0(%arg0: i32, %arg1: i32) -> (i32, i32) {
    %c1_i32 = arith.constant 1 : i32
    %0 = arith.muli %arg0, %c1_i32 : i32
    %1 = arith.addi %0, %arg1 : i32
    %c0_i32 = arith.constant 0 : i32
    %c0_i32_0 = arith.constant 0 : i32
    return %1, %c0_i32 : i32, i32
  }
  func.func @transform_1(%arg0: i32, %arg1: i32) -> (i32, i32) {
    %c1_i32 = arith.constant 1 : i32
    %0 = arith.muli %arg0, %c1_i32 : i32
    %1 = arith.addi %0, %arg1 : i32
    %c0_i32 = arith.constant 0 : i32
    %c0_i32_0 = arith.constant 0 : i32
    return %1, %c0_i32 : i32, i32
  }
  func.func @transform_2(%arg0: i32, %arg1: i32) -> (i32, i32) {
    %c0_i32 = arith.constant 0 : i32
    %c0_i32_0 = arith.constant 0 : i32
    return %arg0, %c0_i32 : i32, i32
  }
}

</mosaic_0001>

<bundles_post_ra>
// kernel: tpu_custom_call.1
= control target key start
LH: loop header
LB: loop body
LE: loop exit
PB: predicated region body
PF: predicated region fallthrough
CT: control target
= control target key end

     0   :  { %7 = vsyncpa [#allocation3], 0  ;;  %s276_s0 = inlined_call_operand.hbm [shape: f32[16,128], index: 0, kind: input, shape index: {}]   ;;  %s277_s1 = inlined_call_operand.hbm [shape: f32[16,128], index: 1, kind: input, shape index: {}]   ;;  %s278_s2 = inlined_call_operand.hbm [shape: f32[8,128], index: 2, kind: output, shape index: {}]  }
   0x1   :  { %8 = vsyncpa [#allocation6], 0 }
   0x2   :  { %9 = vsyncpa [#allocation4], 0  ;;  %s247_s9 = smov [#allocation2]  }
   0x3   :  { %s19_s10 = sshll.u32 %s247_s9, 4  ;;  %s20_s10 = int_to_ptr.vmem [resolvable:$true] %s19_s10 }
   0x4   :  { %s189_s11 = scalar_lea.vmem %s20_s10, 256  ;;  %p194_p1 = scmp.lt.s32.totalorder %s20_s10, %s20_s10 }
   0x5   :  { %p190_p0 = scmp.ne.s32.totalorder %s20_s10, %s189_s11  ;;  %p195_p2 = scmp.lt.s32.totalorder %s189_s11, %s189_s11 }
   0x7   :  { %p196_p3 = por %p195_p2, %p194_p1 }
   0x9   :  { %p197_p4 = pnand %p196_p3, %p190_p0 }
   0xb   :  { %200 = shalt.err (!%p197_p4)
}
   0xc   :  { %s248_s12 = smov 128   ;;  %s249_s13 = smov 8  }
   0xd   :  { %25 = dma.hbm_to_vmem [thread:$0]  %s276_s0, 256, %s20_s10, [#allocation3], %s248_s12, %s248_s12, %s249_s13  }
   0xe   :  { %s250_s16 = smov [#allocation5]  }
   0xf   :  { %s35_s17 = sshll.u32 %s250_s16, 4  ;;  %s36_s17 = int_to_ptr.vmem [resolvable:$true] %s35_s17 }
  0x10   :  { %s209_s18 = scalar_lea.vmem %s36_s17, 256  ;;  %p214_p6 = scmp.lt.s32.totalorder %s36_s17, %s36_s17 }
  0x11   :  { %p210_p5 = scmp.ne.s32.totalorder %s36_s17, %s209_s18  ;;  %p215_p7 = scmp.lt.s32.totalorder %s209_s18, %s209_s18 }
  0x13   :  { %p216_p8 = por %p215_p7, %p214_p6 }
  0x15   :  { %p217_p9 = pnand %p216_p8, %p210_p5 }
  0x17   :  { %220 = shalt.err (!%p217_p9)
}
  0x18   :  { %41 = dma.hbm_to_vmem [thread:$0]  %s277_s1, 256, %s36_s17, [#allocation6], %s248_s12, %s248_s12, %s249_s13  }
  0x19   :  { %241 = dma.done.wait [#allocation3], 256  }
  0x1a   :  { %242 = vsyncadd [#allocation3], 4294967040 }
  0x1b   :  { %243 = dma.done.wait [#allocation6], 256  }
  0x1c   :  { %244 = vsyncadd [#allocation6], 4294967040  ;;  %v57_v0 = vld [vmem:[#allocation2] sm:$0xff]  ;;  %v58_v1 = vld [vmem:[#allocation2 + $0x8] sm:$0xff]  ;;  %s251_s0 = smov [#allocation7]  }
  0x1d   :  { %v61_v2 = vand.u32 2147483647, %v57_v0  ;;  %v62_v3 = vand.u32 2147483647, %v58_v1  ;;  %vm101_vm0 = vcmp.ge.f32.partialorder %v57_v0, 0.0  ;;  %v59_v14 = vld [vmem:[#allocation5] sm:$0xff] }
  0x1e   :  { %vm102_vm1 = vcmp.ge.f32.partialorder %v58_v1, 0.0  ;;  %v60_v16 = vld [vmem:[#allocation5 + $0x8] sm:$0xff]  ;;  %v69_v32 = vmax.f32 %v57_v0, 0.0  ;;  %v70_v33 = vmax.f32 %v58_v1, 0.0  ;;  %v71_v34 = vmul.f32 %v59_v14, %v57_v0  ;;  %s149_s1 = sshll.u32 %s251_s0, 4  ;;  %s150_s1 = int_to_ptr.vmem [resolvable:$true] %s149_s1 }
  0x1f   :  { %v63_v4 = vsub.f32 0.0, %v61_v2  ;;  %v64_v5 = vsub.f32 0.0, %v62_v3  ;;  %v109_v35 = vsub.f32 1.0, %v59_v14  ;;  %v72_v36 = vmul.f32 %v60_v16, %v58_v1  ;;  %s221_s21 = scalar_lea.vmem %s150_s1, 128  ;;  %p226_p11 = scmp.lt.s32.totalorder %s150_s1, %s150_s1 }
  0x20   :  { %v110_v39 = vsub.f32 1.0, %v60_v16  ;;  %v73_v42 = vsub.f32 %v69_v32, %v71_v34  ;;  %v107_v43 = vmul.f32 0.25, %v59_v14  ;;  %v108_v47 = vmul.f32 0.25, %v60_v16  ;;  %p222_p10 = scmp.ne.s32.totalorder %s150_s1, %s221_s21  ;;  %p227_p12 = scmp.lt.s32.totalorder %s221_s21, %s221_s21 }
  0x21   :  { %v65_v6 = vmul.f32 1.442695, %v63_v4  ;;  %v67_v7 = vmul.f32 1.442695, %v64_v5  ;;  %v111_v44 = vmul.f32 0.75, %v109_v35  ;;  %v74_v45 = vsub.f32 %v70_v33, %v72_v36 }
  0x22   :  { %v112_v48 = vmul.f32 0.75, %v110_v39  ;;  %p228_p13 = por %p227_p12, %p226_p11 }
  0x23   :  { %165 = vpow2.f32 %v65_v6  ;;  %v113_v51 = vadd.f32 %v111_v44, %v107_v43 }
  0x24   :  { %167 = vpow2.f32 %v67_v7  ;;  %v114_v54 = vadd.f32 %v112_v48, %v108_v47  ;;  %p229_p0 = pnand %p228_p13, %p222_p10 }
  0x30   :  { %v166_v8 = vpop.eup %165 }
  0x31   :  { %v168_v9 = vpop.eup %167  ;;  %v75_v10 = vadd.f32 1.0, %v166_v8  ;;  %v78_v21 = vmul.f32 -0.5, %v166_v8  ;;  %v81_v28 = vand.u32 2147483647, %v166_v8 }
  0x32   :  { %v84_v11 = vadd.f32 1.0, %v168_v9  ;;  %v87_v23 = vmul.f32 -0.5, %v168_v9  ;;  %v90_v31 = vand.u32 2147483647, %v168_v9 }
  0x33   :  { %169 = vrcp.f32 %v75_v10  ;;  %v79_v26 = vadd.f32 1.0, %v78_v21  ;;  %vm82_vm2 = vcmp.lt.f32.partialorder %v81_v28, 0.0004427343 }
  0x34   :  { %171 = vrcp.f32 %v84_v11  ;;  %v88_v29 = vadd.f32 1.0, %v87_v23  ;;  %vm91_vm3 = vcmp.lt.f32.partialorder %v90_v31, 0.0004427343 }
  0x35   :  { %173 = vlog2.f32 %v75_v10  ;;  %v80_v38 = vmul.f32 %v166_v8, %v79_v26 }
  0x36   :  { %175 = vlog2.f32 %v84_v11  ;;  %v89_v41 = vmul.f32 %v168_v9, %v88_v29 }
  0x40   :  { %v170_v12 = vpop.eup %169 }
  0x41   :  { %v172_v13 = vpop.eup %171  ;;  %v103_v15 = vmul.f32 %v170_v12, %v166_v8 }
  0x42   :  { %v104_v17 = vmul.f32 %v172_v13, %v168_v9  ;;  %v174_v27 = vpop.eup %173 }
  0x43   :  { %v105_v18 = vsel %vm101_vm0, %v170_v12, %v103_v15  ;;  %v176_v30 = vpop.eup %175  ;;  %v77_v37 = vmul.f32 0.6931472, %v174_v27 }
  0x44   :  { %v106_v19 = vsel %vm102_vm1, %v172_v13, %v104_v17  ;;  %v115_v20 = vsub.f32 %v59_v14, %v105_v18  ;;  %v86_v40 = vmul.f32 0.6931472, %v176_v30 }
  0x45   :  { %v116_v22 = vsub.f32 %v60_v16, %v106_v19  ;;  %v83_v46 = vsel %vm82_vm2, %v80_v38, %v77_v37 }
  0x46   :  { %v117_v24 = vand.u32 2147483647, %v115_v20  ;;  %v92_v49 = vsel %vm91_vm3, %v89_v41, %v86_v40  ;;  %v93_v50 = vadd.f32 %v83_v46, %v73_v42 }
  0x47   :  { %v118_v25 = vand.u32 2147483647, %v116_v22  ;;  %v94_v53 = vadd.f32 %v92_v49, %v74_v45 }
  0x48   :  { %177 = vrsqrt.f32 %v117_v24  ;;  %vm121_vm4 = vcmp.eq.f32.partialorder %v117_v24, inf  ;;  %v124_v55 = vand.u32 2147483648, %v117_v24  ;;  %vm123_vm5 = vcmp.eq.f32.partialorder %v117_v24, 0.0 }
  0x49   :  { %179 = vrsqrt.f32 %v118_v25  ;;  %vm128_vm6 = vcmp.eq.f32.partialorder %v118_v25, inf  ;;  %v131_v58 = vand.u32 2147483648, %v118_v25  ;;  %vm130_vm7 = vcmp.eq.f32.partialorder %v118_v25, 0.0 }
  0x4a   :  { %v135_v61 = vmul.f32 %v113_v51, %v93_v50  ;;  %v136_v0 = vmul.f32 %v114_v54, %v94_v53 }
  0x55   :  { %v178_v52 = vpop.eup %177 }
  0x56   :  { %v180_v56 = vpop.eup %179  ;;  %v120_v57 = vmul.f32 %v178_v52, %v117_v24 }
  0x57   :  { %v127_v59 = vmul.f32 %v180_v56, %v118_v25 }
  0x58   :  { %v122_v60 = vsel %vm121_vm4, %v117_v24, %v120_v57 }
  0x59   :  { %v125_v62 = vsel %vm123_vm5, %v124_v55, %v122_v60  ;;  %v129_v63 = vsel %vm128_vm6, %v118_v25, %v127_v59 }
  0x5a   :  { %v132_v1 = vsel %vm130_vm7, %v131_v58, %v129_v63  ;;  %v133_v2 = vmul.f32 %v125_v62, %v117_v24 }
  0x5b   :  { %v134_v3 = vmul.f32 %v132_v1, %v118_v25 }
  0x5c   :  { %v137_v4 = vmul.f32 %v135_v61, %v133_v2 }
  0x5d   :  { %v138_v5 = vmul.f32 %v136_v0, %v134_v3 }
  0x5f   :  { %v140_v6 = vadd.f32 %v138_v5, %v137_v4 }
  0x61   :  { %142 = vst [vmem:[#allocation7] sm:$0xff] %v140_v6 }
  0x62   :  { %232 = shalt.err (!%p229_p0)
}
  0x63   :  { %152 = dma.vmem_to_hbm [thread:$0]  %s150_s1, 128, %s278_s2, [#allocation4]  }
  0x64   :  { %245 = dma.done.wait [#allocation4], 128  }
  0x65   :  { %246 = vsyncadd [#allocation4], 4294967168 }
  0x66   :  { %156 = vsyncpa [#allocation3], 1 }
  0x67   :  { %157 = vsyncpa [#allocation6], 1 }
  0x68   :  { %158 = vsyncpa [#allocation4], 1 }

</bundles_post_ra>
